<compile_context>
chip_gen: v7x
topology: tpu7x:2x2x1
jax: 0.10.0
libtpu: 0.0.40
codegen_flags: <defaults>
</compile_context>

<pallas_src>
import numpy as np
import jax
import jax.numpy as jnp
from jax.experimental import pallas as pl
from jax.experimental.pallas import tpu as pltpu


def _round_up(x, m):
    return ((x + m - 1) // m) * m


# ----------------------------------------------------------------------------
# Host-side (numpy) parameter tables — index math only, no hot compute.
# ----------------------------------------------------------------------------

def build_channel_mix(saturation, hue_rad):
    """Fused 3x3 RGB matrix = hue rotation (YIQ) o saturation blend."""
    yiq_from_rgb = np.array(
        [[0.299, 0.587, 0.114],
         [0.596, -0.274, -0.322],
         [0.211, -0.523, 0.312]], dtype=np.float64)
    rgb_from_yiq = np.linalg.inv(yiq_from_rgb)
    c, s = np.cos(hue_rad), np.sin(hue_rad)
    rot = np.array([[1.0, 0.0, 0.0],
                    [0.0, c, -s],
                    [0.0, s, c]], dtype=np.float64)
    hue_m = rgb_from_yiq @ rot @ yiq_from_rgb
    luma = np.array([0.299, 0.587, 0.114], dtype=np.float64)
    sat_m = saturation * np.eye(3) + (1.0 - saturation) * np.outer(np.ones(3), luma)
    return (hue_m @ sat_m).astype(np.float32)


def build_row_mix(B, C, rows, saturation, hue_rad):
    """Block-diagonal (rows, rows) row-mix matrix for batch-major (b*C+c) rows.

    Padding rows/cols (beyond B*C) are zero, so padded LHS rows never
    contaminate the output and the output's padded rows stay zero.
    """
    mix3 = build_channel_mix(saturation, hue_rad)
    m = np.zeros((rows, rows), np.float32)
    for b in range(B):
        m[b * C:(b + 1) * C, b * C:(b + 1) * C] = mix3
    return m


def build_rotation_sampling_matrices(H, W, angle_deg):
    """Return (S_bilinear.T, S_nearest.T) as numpy (HW, HW) float32.

    out_flat = S @ in_flat, i.e. out_rows = in_rows @ S.T, for a rotation
    about the image center with zero padding outside the canvas.
    """
    theta = np.deg2rad(angle_deg)
    cy, cx = (H - 1) / 2.0, (W - 1) / 2.0
    ii, jj = np.meshgrid(np.arange(H), np.arange(W), indexing="ij")
    dy = ii - cy
    dx = jj - cx
    xs = np.cos(theta) * dx + np.sin(theta) * dy + cx
    ys = -np.sin(theta) * dx + np.cos(theta) * dy + cy

    HW = H * W
    rows = (ii * W + jj).reshape(-1)

    # bilinear (image)
    x0 = np.floor(xs).astype(np.int64)
    y0 = np.floor(ys).astype(np.int64)
    x1 = x0 + 1
    y1 = y0 + 1
    wx1 = xs - x0
    wx0 = 1.0 - wx1
    wy1 = ys - y0
    wy0 = 1.0 - wy1
    s_bil = np.zeros((HW, HW), np.float32)
    for yc, xc, wy, wx in [(y0, x0, wy0, wx0), (y0, x1, wy0, wx1),
                           (y1, x0, wy1, wx0), (y1, x1, wy1, wx1)]:
        valid = (yc >= 0) & (yc < H) & (xc >= 0) & (xc < W)
        cols = (np.clip(yc, 0, H - 1) * W + np.clip(xc, 0, W - 1)).reshape(-1)
        w = (wy * wx * valid).reshape(-1).astype(np.float32)
        np.add.at(s_bil, (rows, cols), w)

    # nearest (mask)
    xn = np.round(xs).astype(np.int64)
    yn = np.round(ys).astype(np.int64)
    valid = (yn >= 0) & (yn < H) & (xn >= 0) & (xn < W)
    cols = (np.clip(yn, 0, H - 1) * W + np.clip(xn, 0, W - 1)).reshape(-1)
    s_nn = np.zeros((HW, HW), np.float32)
    np.add.at(s_nn, (rows, cols), valid.reshape(-1).astype(np.float32))

    return s_bil.T.astype(np.float32), s_nn.T.astype(np.float32)


# ----------------------------------------------------------------------------
# Fused Pallas kernel: ColorJiggle + bilinear image warp + nearest mask warp
# for ALL pipelines in a single pallas_call, K/N-tiled with f32 accumulators.
# ----------------------------------------------------------------------------

def _make_dispatcher_kernel():
    def kernel(params_ref, mix_ref, img_ref, msk_ref, sbil_ref, snn_ref,
               oimg_ref, omsk_ref, acc_img_ref, acc_msk_ref):
        p = pl.program_id(0)                  # pipeline
        k = pl.program_id(2)                  # K (input-pixel) tile
        last_k = pl.num_programs(2) - 1

        @pl.when(k == 0)
        def _init():
            acc_img_ref[...] = jnp.zeros_like(acc_img_ref)
            acc_msk_ref[...] = jnp.zeros_like(acc_msk_ref)

        # -- ColorJiggle on the current K block (image only), f32 VPU math ---
        bf = params_ref[p, 0]                 # brightness
        cf = params_ref[p, 1]                 # contrast
        x = img_ref[...]                      # (RI, TK) f32, batch-major rows
        x = jnp.clip(x * bf, 0.0, 1.0)
        x = jnp.clip((x - 0.5) * cf + 0.5, 0.0, 1.0)
        # Fused saturation + hue as a tiny block-diagonal row-mix matmul
        # (no per-channel partial-sublane stores, single clamp).
        jig = jnp.clip(
            jnp.dot(mix_ref[...], x, preferred_element_type=jnp.float32),
            0.0, 1.0)

        # -- Warp matmuls on the MXU: bf16 operands, f32 accumulation --------
        acc_img_ref[...] += jnp.dot(jig.astype(jnp.bfloat16), sbil_ref[...],
                                    preferred_element_type=jnp.float32)
        acc_msk_ref[...] += jnp.dot(msk_ref[...], snn_ref[...],
                                    preferred_element_type=jnp.float32)

        @pl.when(k == last_k)
        def _finalize():
            oimg_ref[...] = acc_img_ref[...]
            omsk_ref[...] = acc_msk_ref[...]

    return kernel


def dispatch_augmentations(image, mask, augmentations):
    """Run all pipelines on (image, mask) in one fused pallas_call.

    Returns (imgs, msks) with shapes (P, B, C, H, W) / (P, Bm, Cm, H, W).
    """
    B, C, H, W = image.shape
    Bm, Cm, Hm, Wm = mask.shape
    if C != 3:
        raise ValueError("image must have 3 channels for ColorJiggle")
    if (Hm, Wm) != (H, W):
        raise ValueError("image and mask spatial sizes must match")

    HW = H * W
    P = len(augmentations)

    # LHS rows padded to full sublane tiles (no masked partial-sublane ops).
    RI = _round_up(B * C, 8)     # f32 image rows
    RM = _round_up(Bm * Cm, 16)  # bf16 mask rows

    # Lane-dense tiles over the output-pixel (N) and input-pixel (K) axes.
    # Working set per step: 2 RHS tiles x 2 buffers x TK x TN x 2B (~8 MiB at
    # TK=2048, TN=512) + small LHS/acc tiles -> safe on v5e/v6e/v7x VMEM.
    TN = min(512, _round_up(HW, 128))
    TK = min(2048, _round_up(HW, 128))
    N_pad = _round_up(HW, TN)
    K_pad = _round_up(HW, TK)
    NT = N_pad // TN
    KT = K_pad // TK

    # Host-side parameter tables.
    params_np = np.zeros((P, 2), np.float32)
    mix_np = np.zeros((P, RI, RI), np.float32)
    sbil_np = np.zeros((P, K_pad, N_pad), np.float32)
    snn_np = np.zeros((P, K_pad, N_pad), np.float32)
    for i, aug in enumerate(augmentations):
        params_np[i, 0] = aug.brightness
        params_np[i, 1] = aug.contrast
        mix_np[i] = build_row_mix(B, C, RI, aug.saturation, aug.hue_rad)
        sb, sn = build_rotation_sampling_matrices(H, W, aug.angle_deg)
        sbil_np[i, :HW, :HW] = sb
        snn_np[i, :HW, :HW] = sn

    params = jnp.asarray(params_np)                               # (P, 2) f32, SMEM
    mixmat = jnp.asarray(mix_np)                                  # (P, RI, RI) f32
    sbil_t = jnp.asarray(sbil_np, dtype=jnp.bfloat16)             # (P, K_pad, N_pad)
    snn_t = jnp.asarray(snn_np, dtype=jnp.bfloat16)               # (P, K_pad, N_pad)

    # Zero-padded, lane-dense LHS layouts (batch-major rows b*C + c).
    img_p = jnp.pad(image.reshape(B * C, HW).astype(jnp.float32),
                    ((0, RI - B * C), (0, K_pad - HW)))
    msk_p = jnp.pad(mask.reshape(Bm * Cm, HW).astype(jnp.float32),
                    ((0, RM - Bm * Cm), (0, K_pad - HW))).astype(jnp.bfloat16)

    kernel = _make_dispatcher_kernel()

    cost = pl.CostEstimate(
        flops=int(2 * P * K_pad * N_pad * (RI + RM)
                  + P * NT * KT * (2 * RI * RI * TK + 8 * RI * TK)),
        transcendentals=0,
        bytes_accessed=int(2 * P * K_pad * N_pad * 2
                           + P * NT * K_pad * (RI * 4 + RM * 2)
                           + P * (RI + RM) * N_pad * 4),
    )

    out_img_raw, out_msk_raw = pl.pallas_call(
        kernel,
        out_shape=(
            jax.ShapeDtypeStruct((P, RI, N_pad), jnp.float32),
            jax.ShapeDtypeStruct((P, RM, N_pad), jnp.float32),
        ),
        grid=(P, NT, KT),
        in_specs=[
            pl.BlockSpec(memory_space=pltpu.MemorySpace.SMEM),            # per-pipeline scalars
            pl.BlockSpec((None, RI, RI), lambda p, n, k: (p, 0, 0)),      # row-mix matrix
            pl.BlockSpec((RI, TK), lambda p, n, k: (0, k)),               # image K-block (f32)
            pl.BlockSpec((RM, TK), lambda p, n, k: (0, k)),               # mask K-block (bf16)
            pl.BlockSpec((None, TK, TN), lambda p, n, k: (p, k, n)),      # S_bil^T tile
            pl.BlockSpec((None, TK, TN), lambda p, n, k: (p, k, n)),      # S_nn^T  tile
        ],
        out_specs=(
            pl.BlockSpec((None, RI, TN), lambda p, n, k: (p, 0, n)),      # warped image tile
            pl.BlockSpec((None, RM, TN), lambda p, n, k: (p, 0, n)),      # warped mask tile
        ),
        scratch_shapes=[
            pltpu.VMEM((RI, TN), jnp.float32),                            # image accumulator
            pltpu.VMEM((RM, TN), jnp.float32),                            # mask accumulator
        ],
        compiler_params=pltpu.CompilerParams(
            # p and n carry nothing across iterations -> both megacore-safe;
            # only the K-reduction axis is sequential ("arbitrary").
            dimension_semantics=("parallel", "parallel", "arbitrary"),
            vmem_limit_bytes=32 * 1024 * 1024,
        ),
        cost_estimate=cost,
    )(params, mixmat, img_p, msk_p, sbil_t, snn_t)

    out_img = out_img_raw[:, :B * C, :HW].reshape(P, B, C, H, W)
    out_msk = out_msk_raw[:, :Bm * Cm, :HW].reshape(P, Bm, Cm, Hm, Wm)
    return out_img, out_msk


# ----------------------------------------------------------------------------
# AugmentationSequential analogue + dispatcher (API mirrors the PyTorch module)
# ----------------------------------------------------------------------------

class AugmentationSequential:
    """ColorJiggle (image only) + RandomAffine-style rotation (image + mask)."""

    def __init__(self, *, brightness, contrast, saturation, hue_rad,
                 angle_deg, data_keys=("input", "mask")):
        self.data_keys = tuple(data_keys)
        self.brightness = float(brightness)
        self.contrast = float(contrast)
        self.saturation = float(saturation)
        self.hue_rad = float(hue_rad)
        self.angle_deg = float(angle_deg)

    def __call__(self, image, mask):
        img, msk = dispatch_augmentations(image, mask, [self])
        return img[0], msk[0]


class ManyToOneAugmentationDispather:
    def __init__(self, *augmentations, strict=True):
        self.strict = strict
        self._check_consistency(*augmentations)
        self.augmentations = augmentations

    def _check_consistency(self, *augmentations):
        for i, aug in enumerate(augmentations):
            if not isinstance(aug, AugmentationSequential):
                raise ValueError(
                    f"Please wrap your augmentations[`{i}`] with "
                    f"`AugmentationSequential`."
                )
            if self.strict and i != 0 and (
                aug.data_keys != augmentations[i - 1].data_keys
            ):
                raise RuntimeError(
                    f"Different `data_keys` between {i - 1} and {i} elements, "
                    f"got {aug.data_keys} and {augmentations[i - 1].data_keys}."
                )
        return True

    def __call__(self, image, mask):
        # All pipelines are fused into ONE pallas_call; grid axes 0 (pipeline)
        # and 1 (output-pixel tile) are "parallel" for megacore sharding.
        img_all, msk_all = dispatch_augmentations(
            image, mask, list(self.augmentations))
        return [(img_all[i], msk_all[i]) for i in range(len(self.augmentations))]


# ----------------------------------------------------------------------------
# Pure-numpy reference (same deterministic math) for a correctness check.
# ----------------------------------------------------------------------------

def _reference_pipeline(image_np, mask_np, aug):
    B, C, H, W = image_np.shape
    x = image_np.astype(np.float64)
    x = np.clip(x * aug.brightness, 0.0, 1.0)
    x = np.clip((x - 0.5) * aug.contrast + 0.5, 0.0, 1.0)
    mix = build_channel_mix(aug.saturation, aug.hue_rad).astype(np.float64)
    x = np.clip(np.einsum("ck,bkhw->bchw", mix, x), 0.0, 1.0)
    sb_t, sn_t = build_rotation_sampling_matrices(H, W, aug.angle_deg)
    img = (x.reshape(B * C, H * W) @ sb_t.astype(np.float64)).reshape(B, C, H, W)
    msk = (mask_np.reshape(-1, H * W).astype(np.float64)
           @ sn_t.astype(np.float64)).reshape(mask_np.shape)
    return img.astype(np.float32), msk.astype(np.float32)


# ----------------------------------------------------------------------------
# Demo
# ----------------------------------------------------------------------------

if __name__ == "__main__":
    B, C, H, W = 2, 3, 16, 16
    key = jax.random.PRNGKey(0)
    image = jax.random.uniform(key, (B, C, H, W), dtype=jnp.float32)
    mask = jnp.ones((B, C, H, W), dtype=jnp.float32)

    augs = (
        AugmentationSequential(brightness=1.05, contrast=0.95, saturation=1.08,
                               hue_rad=0.05, angle_deg=30.0,
                               data_keys=("input", "mask")),
        AugmentationSequential(brightness=0.92, contrast=1.07, saturation=0.90,
                               hue_rad=-0.04, angle_deg=-45.0,
                               data_keys=("input", "mask")),
    )
    dispatcher = ManyToOneAugmentationDispather(*augs)

    outputs = dispatcher(image, mask)        # list of (image, mask) tuples
    for img_out, msk_out in outputs:
        jax.block_until_ready(img_out)
        jax.block_until_ready(msk_out)

    # Correctness check against the numpy reference (bf16 MXU tolerance).
    image_np = np.asarray(image)
    mask_np = np.asarray(mask)
    for i, aug in enumerate(augs):
        ref_img, ref_msk = _reference_pipeline(image_np, mask_np, aug)
        img_out, msk_out = outputs[i]
        assert img_out.shape == (B, C, H, W) and msk_out.shape == (B, C, H, W)
        assert bool(jnp.all(jnp.isfinite(img_out)))
        assert bool(jnp.all(jnp.isfinite(msk_out)))
        np.testing.assert_allclose(np.asarray(img_out), ref_img, atol=5e-2, rtol=0)
        np.testing.assert_allclose(np.asarray(msk_out), ref_msk, atol=1e-2, rtol=0)

    print("KERNEL_OK")
</pallas_src>

<mosaic_0001>
module attributes {stable_mosaic.version = 11 : i64} {
  func.func @kernel(%arg0: i32, %arg1: i32, %arg2: i32, %arg3: memref<2x2xf32, #tpu.memory_space<smem>>, %arg4: memref<1x8x8xf32, #tpu.memory_space<vmem>>, %arg5: memref<8x256xf32, #tpu.memory_space<vmem>>, %arg6: memref<16x256xbf16, #tpu.memory_space<vmem>>, %arg7: memref<1x256x256xbf16, #tpu.memory_space<vmem>>, %arg8: memref<1x256x256xbf16, #tpu.memory_space<vmem>>, %arg9: memref<1x8x256xf32, #tpu.memory_space<vmem>>, %arg10: memref<1x16x256xf32, #tpu.memory_space<vmem>>, %arg11: memref<8x256xf32, #tpu.memory_space<vmem>>, %arg12: memref<16x256xf32, #tpu.memory_space<vmem>>) attributes {dimension_semantics = [#tpu.dimension_semantics<parallel>, #tpu.dimension_semantics<parallel>, #tpu.dimension_semantics<arbitrary>], iteration_bounds = array<i64: 2, 1, 1>, scalar_prefetch = 0 : i64, scratch_operands = 2 : i64, tpu.core_type = #tpu.core_type<tc>, window_params = [{transform_indices = @transform_0, window_bounds = array<i64: 2, 2>}, {transform_indices = @transform_1, window_bounds = array<i64: 1, 8, 8>}, {transform_indices = @transform_2, window_bounds = array<i64: 8, 256>}, {transform_indices = @transform_3, window_bounds = array<i64: 16, 256>}, {transform_indices = @transform_4, window_bounds = array<i64: 1, 256, 256>}, {transform_indices = @transform_5, window_bounds = array<i64: 1, 256, 256>}, {transform_indices = @transform_6, window_bounds = array<i64: 1, 8, 256>}, {transform_indices = @transform_7, window_bounds = array<i64: 1, 16, 256>}]} {
    %c0_i32 = arith.constant 0 : i32
    %0 = arith.cmpi eq, %arg2, %c0_i32 : i32
    %1 = arith.extui %0 : i1 to i32
    %c0_i32_0 = arith.constant 0 : i32
    %2 = arith.cmpi ne, %1, %c0_i32_0 : i32
    scf.if %2 {
      %cst_34 = arith.constant 0.000000e+00 : f32
      %48 = vector.broadcast %cst_34 : f32 to vector<8x256xf32>
      %c0_35 = arith.constant 0 : index
      %c0_36 = arith.constant 0 : index
      %49 = vector.load %arg11[%c0_35, %c0_36] : memref<8x256xf32, #tpu.memory_space<vmem>>, vector<8x256xf32>
      tpu.vector_store %arg11[%c0_35, %c0_36], %48 {strides = array<i32>} : memref<8x256xf32, #tpu.memory_space<vmem>>, vector<8x256xf32>,
      %cst_37 = arith.constant 0.000000e+00 : f32
      %50 = vector.broadcast %cst_37 : f32 to vector<16x256xf32>
      %c0_38 = arith.constant 0 : index
      %c0_39 = arith.constant 0 : index
      %51 = vector.load %arg12[%c0_38, %c0_39] : memref<16x256xf32, #tpu.memory_space<vmem>>, vector<16x256xf32>
      tpu.vector_store %arg12[%c0_38, %c0_39], %50 {strides = array<i32>} : memref<16x256xf32, #tpu.memory_space<vmem>>, vector<16x256xf32>,
    } else {
    }
    %3 = arith.index_cast %arg0 : i32 to index
    %c0 = arith.constant 0 : index
    %4 = memref.load %arg3[%3, %c0] : memref<2x2xf32, #tpu.memory_space<smem>>
    %5 = arith.index_cast %arg0 : i32 to index
    %c1 = arith.constant 1 : index
    %6 = memref.load %arg3[%5, %c1] : memref<2x2xf32, #tpu.memory_space<smem>>
    %c0_1 = arith.constant 0 : index
    %c0_2 = arith.constant 0 : index
    %7 = vector.load %arg5[%c0_1, %c0_2] : memref<8x256xf32, #tpu.memory_space<vmem>>, vector<8x256xf32>
    %8 = vector.broadcast %4 : f32 to vector<8x256xf32>
    %9 = arith.mulf %7, %8 : vector<8x256xf32>
    %cst = arith.constant 0.000000e+00 : f32
    %cst_3 = arith.constant 1.000000e+00 : f32
    %10 = vector.broadcast %cst : f32 to vector<8x256xf32>
    %11 = arith.maximumf %10, %9 : vector<8x256xf32>
    %12 = vector.broadcast %cst_3 : f32 to vector<8x256xf32>
    %13 = arith.minimumf %12, %11 : vector<8x256xf32>
    %cst_4 = arith.constant 5.000000e-01 : f32
    %14 = vector.broadcast %cst_4 : f32 to vector<8x256xf32>
    %15 = arith.subf %13, %14 : vector<8x256xf32>
    %16 = vector.broadcast %6 : f32 to vector<8x256xf32>
    %17 = arith.mulf %15, %16 : vector<8x256xf32>
    %cst_5 = arith.constant 5.000000e-01 : f32
    %18 = vector.broadcast %cst_5 : f32 to vector<8x256xf32>
    %19 = arith.addf %17, %18 : vector<8x256xf32>
    %cst_6 = arith.constant 0.000000e+00 : f32
    %cst_7 = arith.constant 1.000000e+00 : f32
    %20 = vector.broadcast %cst_6 : f32 to vector<8x256xf32>
    %21 = arith.maximumf %20, %19 : vector<8x256xf32>
    %22 = vector.broadcast %cst_7 : f32 to vector<8x256xf32>
    %23 = arith.minimumf %22, %21 : vector<8x256xf32>
    %c0_8 = arith.constant 0 : index
    %c0_9 = arith.constant 0 : index
    %c0_10 = arith.constant 0 : index
    %24 = vector.load %arg4[%c0_8, %c0_9, %c0_10] : memref<1x8x8xf32, #tpu.memory_space<vmem>>, vector<1x8x8xf32>
    %25 = vector.shape_cast %24 : vector<1x8x8xf32> to vector<8x8xf32>
    %cst_11 = arith.constant dense<0.000000e+00> : vector<8x256xf32>
    %26 = tpu.matmul %25, %23, %cst_11 {dimension_numbers = #tpu.dot_dimension_numbers<[1], [0], [0], [1], [0, 0, 1, 1], [], []>} : vector<8x8xf32>, vector<8x256xf32>, vector<8x256xf32> -> vector<8x256xf32>
    %cst_12 = arith.constant 0.000000e+00 : f32
    %cst_13 = arith.constant 1.000000e+00 : f32
    %27 = vector.broadcast %cst_12 : f32 to vector<8x256xf32>
    %28 = arith.maximumf %27, %26 : vector<8x256xf32>
    %29 = vector.broadcast %cst_13 : f32 to vector<8x256xf32>
    %30 = arith.minimumf %29, %28 : vector<8x256xf32>
    %c0_14 = arith.constant 0 : index
    %c0_15 = arith.constant 0 : index
    %31 = vector.load %arg11[%c0_14, %c0_15] : memref<8x256xf32, #tpu.memory_space<vmem>>, vector<8x256xf32>
    %32 = arith.truncf %30 : vector<8x256xf32> to vector<8x256xbf16>
    %c0_16 = arith.constant 0 : index
    %c0_17 = arith.constant 0 : index
    %c0_18 = arith.constant 0 : index
    %33 = vector.load %arg7[%c0_16, %c0_17, %c0_18] : memref<1x256x256xbf16, #tpu.memory_space<vmem>>, vector<1x256x256xbf16>
    %34 = vector.shape_cast %33 : vector<1x256x256xbf16> to vector<256x256xbf16>
    %cst_19 = arith.constant dense<0.000000e+00> : vector<8x256xf32>
    %35 = tpu.matmul %32, %34, %cst_19 {dimension_numbers = #tpu.dot_dimension_numbers<[1], [0], [0], [1], [0, 0, 1, 1], [], []>} : vector<8x256xbf16>, vector<256x256xbf16>, vector<8x256xf32> -> vector<8x256xf32>
    %36 = arith.addf %31, %35 : vector<8x256xf32>
    %c0_20 = arith.constant 0 : index
    %c0_21 = arith.constant 0 : index
    %37 = vector.load %arg11[%c0_20, %c0_21] : memref<8x256xf32, #tpu.memory_space<vmem>>, vector<8x256xf32>
    tpu.vector_store %arg11[%c0_20, %c0_21], %36 {strides = array<i32>} : memref<8x256xf32, #tpu.memory_space<vmem>>, vector<8x256xf32>,
    %c0_22 = arith.constant 0 : index
    %c0_23 = arith.constant 0 : index
    %38 = vector.load %arg12[%c0_22, %c0_23] : memref<16x256xf32, #tpu.memory_space<vmem>>, vector<16x256xf32>
    %c0_24 = arith.constant 0 : index
    %c0_25 = arith.constant 0 : index
    %39 = vector.load %arg6[%c0_24, %c0_25] : memref<16x256xbf16, #tpu.memory_space<vmem>>, vector<16x256xbf16>
    %c0_26 = arith.constant 0 : index
    %c0_27 = arith.constant 0 : index
    %c0_28 = arith.constant 0 : index
    %40 = vector.load %arg8[%c0_26, %c0_27, %c0_28] : memref<1x256x256xbf16, #tpu.memory_space<vmem>>, vector<1x256x256xbf16>
    %41 = vector.shape_cast %40 : vector<1x256x256xbf16> to vector<256x256xbf16>
    %cst_29 = arith.constant dense<0.000000e+00> : vector<16x256xf32>
    %42 = tpu.matmul %39, %41, %cst_29 {dimension_numbers = #tpu.dot_dimension_numbers<[1], [0], [0], [1], [0, 0, 1, 1], [], []>} : vector<16x256xbf16>, vector<256x256xbf16>, vector<16x256xf32> -> vector<16x256xf32>
    %43 = arith.addf %38, %42 : vector<16x256xf32>
    %c0_30 = arith.constant 0 : index
    %c0_31 = arith.constant 0 : index
    %44 = vector.load %arg12[%c0_30, %c0_31] : memref<16x256xf32, #tpu.memory_space<vmem>>, vector<16x256xf32>
    tpu.vector_store %arg12[%c0_30, %c0_31], %43 {strides = array<i32>} : memref<16x256xf32, #tpu.memory_space<vmem>>, vector<16x256xf32>,
    %c0_i32_32 = arith.constant 0 : i32
    %45 = arith.cmpi eq, %arg2, %c0_i32_32 : i32
    %46 = arith.extui %45 : i1 to i32
    %c0_i32_33 = arith.constant 0 : i32
    %47 = arith.cmpi ne, %46, %c0_i32_33 : i32
    scf.if %47 {
      %c0_34 = arith.constant 0 : index
      %c0_35 = arith.constant 0 : index
      %48 = vector.load %arg11[%c0_34, %c0_35] : memref<8x256xf32, #tpu.memory_space<vmem>>, vector<8x256xf32>
      %c0_36 = arith.constant 0 : index
      %c0_37 = arith.constant 0 : index
      %c0_38 = arith.constant 0 : index
      %49 = vector.load %arg9[%c0_36, %c0_37, %c0_38] : memref<1x8x256xf32, #tpu.memory_space<vmem>>, vector<1x8x256xf32>
      %50 = vector.shape_cast %49 : vector<1x8x256xf32> to vector<8x256xf32>
      %51 = vector.shape_cast %48 : vector<8x256xf32> to vector<1x8x256xf32>
      tpu.vector_store %arg9[%c0_36, %c0_37, %c0_38], %51 {strides = array<i32>} : memref<1x8x256xf32, #tpu.memory_space<vmem>>, vector<1x8x256xf32>,
      %c0_39 = arith.constant 0 : index
      %c0_40 = arith.constant 0 : index
      %52 = vector.load %arg12[%c0_39, %c0_40] : memref<16x256xf32, #tpu.memory_space<vmem>>, vector<16x256xf32>
      %c0_41 = arith.constant 0 : index
      %c0_42 = arith.constant 0 : index
      %c0_43 = arith.constant 0 : index
      %53 = vector.load %arg10[%c0_41, %c0_42, %c0_43] : memref<1x16x256xf32, #tpu.memory_space<vmem>>, vector<1x16x256xf32>
      %54 = vector.shape_cast %53 : vector<1x16x256xf32> to vector<16x256xf32>
      %55 = vector.shape_cast %52 : vector<16x256xf32> to vector<1x16x256xf32>
      tpu.vector_store %arg10[%c0_41, %c0_42, %c0_43], %55 {strides = array<i32>} : memref<1x16x256xf32, #tpu.memory_space<vmem>>, vector<1x16x256xf32>,
    } else {
    }
    return
  }
  func.func @transform_0(%arg0: i32, %arg1: i32, %arg2: i32) -> (i32, i32) {
    %c0_i32 = arith.constant 0 : i32
    %c0_i32_0 = arith.constant 0 : i32
    %c0_i32_1 = arith.constant 0 : i32
    return %c0_i32, %c0_i32_0 : i32, i32
  }
  func.func @transform_1(%arg0: i32, %arg1: i32, %arg2: i32) -> (i32, i32, i32) {
    %c0_i32 = arith.constant 0 : i32
    %c0_i32_0 = arith.constant 0 : i32
    %c0_i32_1 = arith.constant 0 : i32
    return %arg0, %c0_i32, %c0_i32_0 : i32, i32, i32
  }
  func.func @transform_2(%arg0: i32, %arg1: i32, %arg2: i32) -> (i32, i32) {
    %c0_i32 = arith.constant 0 : i32
    %c0_i32_0 = arith.constant 0 : i32
    return %c0_i32, %arg2 : i32, i32
  }
  func.func @transform_3(%arg0: i32, %arg1: i32, %arg2: i32) -> (i32, i32) {
    %c0_i32 = arith.constant 0 : i32
    %c0_i32_0 = arith.constant 0 : i32
    return %c0_i32, %arg2 : i32, i32
  }
  func.func @transform_4(%arg0: i32, %arg1: i32, %arg2: i32) -> (i32, i32, i32) {
    %c0_i32 = arith.constant 0 : i32
    return %arg0, %arg2, %arg1 : i32, i32, i32
  }
  func.func @transform_5(%arg0: i32, %arg1: i32, %arg2: i32) -> (i32, i32, i32) {
    %c0_i32 = arith.constant 0 : i32
    return %arg0, %arg2, %arg1 : i32, i32, i32
  }
  func.func @transform_6(%arg0: i32, %arg1: i32, %arg2: i32) -> (i32, i32, i32) {
    %c0_i32 = arith.constant 0 : i32
    %c0_i32_0 = arith.constant 0 : i32
    return %arg0, %c0_i32, %arg1 : i32, i32, i32
  }
  func.func @transform_7(%arg0: i32, %arg1: i32, %arg2: i32) -> (i32, i32, i32) {
    %c0_i32 = arith.constant 0 : i32
    %c0_i32_0 = arith.constant 0 : i32
    return %arg0, %c0_i32, %arg1 : i32, i32, i32
  }
}

</mosaic_0001>

<bundles_post_ra>
// kernel: tpu_custom_call.1
= control target key start
LH: loop header
LB: loop body
LE: loop exit
PB: predicated region body
PF: predicated region fallthrough
CT: control target
= control target key end

     0   :  { %s2472_s0 = inlined_call_operand.hbm [shape: f32[2,2], index: 0, kind: input, shape index: {}]   ;;  %s2473_s1 = inlined_call_operand.hbm [shape: f32[2,8,8], index: 1, kind: input, shape index: {}]   ;;  %s2474_s2 = inlined_call_operand.hbm [shape: f32[8,256], index: 2, kind: input, shape index: {}]   ;;  %s2475_s3 = inlined_call_operand.hbm [shape: bf16[16,256], index: 3, kind: input, shape index: {}]   ;;  %s2476_s4 = inlined_call_operand.hbm [shape: bf16[2,256,256], index: 4, kind: input, shape index: {}]   ;;  %s2477_s5 = inlined_call_operand.hbm [shape: bf16[2,256,256], index: 5, kind: input, shape index: {}]   ;;  %s2478_s6 = inlined_call_operand.hbm [shape: f32[2,8,256], index: 6, kind: output, shape index: {0}]   ;;  %s2479_s7 = inlined_call_operand.hbm [shape: f32[2,16,256], index: 7, kind: output, shape index: {1}]  }
   0x1   :  { %2505 = sst [smem:[#allocation31_spill]] %s2474_s2 }
   0x2   :  { %2506 = sst [smem:[#allocation32_spill]] %s2476_s4 }
   0x3   :  { %2507 = sst [smem:[#allocation33_spill]] %s2478_s6 }
   0x4   :  { %2508 = sst [smem:[#allocation34_spill]] %s2479_s7 }
   0x5   :  { %13 = vsyncpa [#allocation7], 0 }
   0x6   :  { %14 = vsyncpa [#allocation5], 0 }
   0x7   :  { %16 = vsyncpa [#allocation5 + $0x1], 0 }
   0x8   :  { %17 = vsyncpa [#allocation10], 0 }
   0x9   :  { %18 = vsyncpa [#allocation13], 0 }
   0xa   :  { %20 = vsyncpa [#allocation13 + $0x1], 0 }
   0xb   :  { %21 = vsyncpa [#allocation6], 0 }
   0xc   :  { %23 = vsyncpa [#allocation6 + $0x1], 0 }
   0xd   :  { %24 = vsyncpa [#allocation17], 0 }
   0xe   :  { %26 = vsyncpa [#allocation17 + $0x1], 0  ;;  %s2020_s24 = smov 0   ;;  %s2022_s25 = smov 0  }
   0xf   :  { %s2024_s26 = smov 0   ;;  %s2026_s27 = smov 0  }
  0x10   :  { %s2028_s28 = smov 0   ;;  %s2030_s29 = smov 0  }
  0x11 LB: > { %2509 = sst [smem:[#allocation24_spill]] %s1945_s24  ;;  %s2051_s30 = sadd.s32 4294967295, %s1965_s29   ;;  %s1965_s29 = sphi %s2030_s29, %s32_s29   ;;  %s1961_s28 = sphi %s2028_s28, %s2559_s28   ;;  %s1957_s27 = sphi %s2026_s27, %s2558_s27   ;;  %s1953_s26 = sphi %s2024_s26, %s2554_s26   ;;  %s1949_s25 = sphi %s2022_s25, %s2557_s25   ;;  %s1945_s24 = sphi %s2020_s24, %s2556_s24  }
  0x12   : > { %2510 = sst [smem:[#allocation25_spill]] %s1953_s26  ;;  %s1363_s8 = sadd.s32 4294967294, %s1965_s29  }
  0x13   : > { %2511 = sst [smem:[#allocation26_spill]] %s1965_s29  ;;  %p86_p0 = scmp.ne.s32.totalorder %s1953_s26, %s1949_s25 }
  0x14   : > { %p87_p1 = scmp.eq.s32.totalorder %s1965_s29, 0  ;;  %p92_p2 = scmp.ne.s32.totalorder %s1949_s25, %s1945_s24 }
  0x15   : > { %p2482_p3 = scmp.eq.s32.totalorder %s2051_s30, 0  ;;  %p230_p4 = scmp.eq.s32.totalorder %s2051_s30, 1 }
  0x16   : > { %p2062_p5 = por %p87_p1, %p86_p0  ;;  %p236_p6 = scmp.eq.s32.totalorder %s1363_s8, 1 }
  0x17   : > { %p2068_p7 = por %p2482_p3, %p92_p2  ;;  %p2072_p8 = por %p230_p4, %p86_p0 }
  0x18   : > { %s2512_s10 = scalar_select %p2062_p5, 1, 0 }
  0x19   : > { %s2513_s11 = scalar_select %p2068_p7, 1, 0 }
  0x1a   : > { %s2514_s12 = scalar_select %p2072_p8, 1, 0 }
  0x1b   : > { %p2076_p9 = por %p236_p6, %p92_p2  ;;  %p1364_p10 = scmp.ge.s32.totalorder %s1965_s29, 1 }
  0x1c   : > { %2515 = sst [smem:[#allocation27_spill]] %s2514_s12  ;;  %p271_p11 = scmp.lt.s32.totalorder %s1965_s29, 3 }
  0x1d   : > { %s2516_s13 = scalar_select %p2076_p9, 1, 0 }
  0x1e   : > { %p2083_p13 = pnand %p1364_p10, %p271_p11  ;;  %s1967_s15 = smov [#allocation9]  }
  0x1f   : > { %2517 = sst [smem:[#allocation28_spill]] %s2516_s13  ;;  %s296_s16 = sshll.u32 %s1967_s15, 4  ;;  %s297_s16 = int_to_ptr.vmem [resolvable:$true] %s296_s16 }
  0x20   : > { %s2518_s14 = scalar_select %p2083_p13, 1, 0 }
  0x21   : > { %p1490_p0 = pneg %p2083_p13  ;;  %s51_s17 = sadd.s32 1, %s1961_s28 }
  0x22   : > { %p2096_p2 = scmp.ge.s32.totalorder %s51_s17, 2  ;;  %s2102_s20 = sand.u32 1, %s1953_s26  }
  0x23   : > { %p2092_p1 = pnand %p1490_p0, %p2482_p3  ;;  %s2521_s2 = sld [smem:[#allocation31_spill]] }
  0x24   : > { %s2520_s19 = scalar_select %p2096_p2, 1, 0 }
  0x25   : > { %s2519_s18 = scalar_select %p2092_p1, 1, 0 }
  0x26   : > { %p2112_p10 = pneg %p2092_p1 }
  0x28   : > { %s2522_s9 = scalar_select %p2112_p10, 1, 0 }
  0x29   : > { %s1680_s23 = scalar_lea.hbm %s2521_s2, 256 }
  0x2a   : > { %p1681_p6 = scmp.ne.s32.totalorder %s2521_s2, %s1680_s23  ;;  %p1687_p12 = scmp.lt.u32.totalorder %s1680_s23, %s2521_s2 }
  0x2c   : > { %p1683_p11 = pnand %p2112_p10, %p1681_p6 }
  0x2e   : > { %p1684_p0 = pneg %p1683_p11 }
  0x30   : > { %p1689_p3 = pnand %p1687_p12, %p1684_p0 }
  0x32   : > { %1692 = shalt.err (!%p1689_p3)
}
  0x33   : > { %s1693_s21 = scalar_lea.vmem %s297_s16, 256  ;;  %p1701_p7 = scmp.lt.s32.totalorder %s297_s16, %s297_s16 }
  0x34   : > { %p1694_p4 = scmp.ne.s32.totalorder %s297_s16, %s1693_s21  ;;  %p1702_p13 = scmp.lt.s32.totalorder %s1693_s21, %s1693_s21 }
  0x36   : > { %p1696_p9 = pnand %p1694_p4, %p2112_p10  ;;  %p1703_p5 = por %p1702_p13, %p1701_p7 }
  0x38   : > { %p1697_p8 = pneg %p1696_p9 }
  0x3a   : > { %p1704_p2 = pnand %p1703_p5, %p1697_p8 }
  0x3c   : > { %1707 = shalt.err (!%p1704_p2)
}
  0x3d   : > { %1496 = dma.hbm_to_vmem [thread:$0]  (!%p2092_p1), %s2521_s2, 256, %s297_s16, [#allocation10]  }
  0x3e   : > { %p2523_p3 = scmp.ne.s32.totalorder %s2520_s19, 0  ;;  %p2525_p5 = scmp.ne.s32.totalorder %s2512_s10, 0 }
  0x3f   : > { %p2526_p7 = scmp.lt.s32.totalorder %s1965_s29, 2  ;;  %s341_s13 = sand.u32 1, %s1965_s29  }
  0x40   : > { %s2561_s17 = smov (%p2523_p3, %s51_s17), 0  ;;  %s2490_s15 = sshll.u32 %s2102_s20, 8 }
  0x41   : > { %2524 = sst [smem:[#allocation29_spill]] %s2561_s17  ;;  %p2136_p8 = pnand %p2526_p7, %p2525_p5 }
  0x42   : > { %s76_s23 = ssub.s32 %s1961_s28, %s2561_s17  ;;  %s1464_s21 = sshll.u32 %s1961_s28, 12 }
  0x43   : > { %s2527_s24 = scalar_select %p2136_p8, 1, 0 }
  0x44   : > { %p77_p9 = scmp.eq.s32.totalorder %s76_s23, 0  ;;  %s2528_s22 = sadd.s32 1, %s1953_s26 }
  0x45   : > { %s2530_s4 = sld [smem:[#allocation32_spill]]  ;;  %s345_s10 = scalar_lea.vmem [#allocation12], %s2490_s15 }
  0x46   : > { %s2148_s8 = scalar_select %p77_p9, %s1953_s26, %s2528_s22  }
  0x47   : > { %s357_s6 = sshll.u32 %s345_s10, 4  ;;  %s2162_s29 = scalar_lea.hbm %s2477_s5, %s1464_s21  ;;  %s2157_s6 = int_to_ptr.vmem [resolvable:$true] %s357_s6 }
  0x48   : > { %2529 = sst [smem:[#allocation30_spill]] %s2148_s8  ;;  %s2164_s22 = scalar_lea.sflag [#allocation13], %s341_s13 }
  0x49   : > { %p2170_p13 = pneg %p2136_p8 }
  0x4b   : > { %s2153_s2 = scalar_lea.hbm %s2530_s4, %s1464_s21  ;;  %s1713_s15 = scalar_lea.hbm %s2530_s4, 8192 }
  0x4c   : > { %s1708_s8 = scalar_lea.hbm %s2153_s2, 4096  ;;  %p1714_p6 = scmp.lt.u32.totalorder %s2153_s2, %s2530_s4 }
  0x4d   : > { %p1709_p12 = scmp.ne.s32.totalorder %s2153_s2, %s1708_s8  ;;  %p1715_p11 = scmp.lt.u32.totalorder %s1713_s15, %s1708_s8 }
  0x4e   : > { %s2531_s16 = scalar_select %p2170_p13, 1, 0 }
  0x4f   : > { %p1711_p2 = pnand %p2170_p13, %p1709_p12  ;;  %p1716_p0 = por %p1715_p11, %p1714_p6 }
  0x50   : > { %p1717_p3 = scmp.lt.u32.totalorder %s1708_s8, %s2153_s2 }
  0x51   : > { %p1712_p4 = pneg %p1711_p2 }
  0x52   : > { %p1718_p5 = por %p1717_p3, %p1716_p0 }
  0x54   : > { %p1719_p7 = pnand %p1718_p5, %p1712_p4 }
  0x56   : > { %1722 = shalt.err (!%p1719_p7)
}
  0x57   : > { %s1723_s13 = scalar_lea.vmem %s2157_s6, 4096  ;;  %s1968_s23 = smov [#allocation12]  }
  0x58   : > { %p1724_p9 = scmp.ne.s32.totalorder %s2157_s6, %s1723_s13  ;;  %s1728_s19 = sshll.u32 %s1968_s23, 4  ;;  %s1729_s19 = int_to_ptr.vmem [resolvable:$false] %s1728_s19 }
  0x59   : > { %s1730_s10 = scalar_lea.vmem %s1729_s19, 8192  ;;  %p1731_p1 = scmp.lt.s32.totalorder %s2157_s6, %s1729_s19 }
  0x5a   : > { %p1726_p12 = pnand %p1724_p9, %p2170_p13  ;;  %p1732_p10 = scmp.lt.s32.totalorder %s1730_s10, %s1723_s13 }
  0x5c   : > { %p1727_p2 = pneg %p1726_p12  ;;  %p1733_p6 = por %p1732_p10, %p1731_p1 }
  0x5e   : > { %p1734_p11 = pnand %p1733_p6, %p1727_p2 }
  0x60   : > { %1737 = shalt.err (!%p1734_p11)
}
  0x61   : > { %s2499_s15 = smov 128   ;;  %s1970_s8 = smov 8  }
  0x62   : > { %1506 = dma.hbm_to_vmem [thread:$0]  (!%p2136_p8), %s2153_s2, 4096, %s2157_s6, %s2164_s22, %s2499_s15, %s2499_s15, %s1970_s8  }
  0x63   : > { %s2532_s17 = sshll.u32 %s2102_s20, 8  ;;  %s1738_s10 = scalar_lea.hbm %s2472_s0, 32 }
  0x64   : > { %s371_s21 = scalar_lea.vmem [#allocation14], %s2532_s17  ;;  %p1739_p1 = scmp.ne.s32.totalorder %s2472_s0, %s1738_s10 }
  0x65   : > { %s383_s23 = sshll.u32 %s371_s21, 4  ;;  %p2533_p10 = scmp.ne.s32.totalorder %s2522_s9, 0  ;;  %s2199_s23 = int_to_ptr.vmem [resolvable:$true] %s383_s23 }
  0x66   : > { %p1745_p3 = scmp.lt.u32.totalorder %s1738_s10, %s2472_s0 }
  0x67   : > { %p1741_p4 = pnand %p1739_p1, %p2533_p10 }
  0x69   : > { %p1742_p0 = pneg %p1741_p4 }
  0x6b   : > { %p1747_p5 = pnand %p1745_p3, %p1742_p0 }
  0x6d   : > { %1750 = shalt.err (!%p1747_p5)
}
  0x6e   : > { %s1971_s2 = smov [#allocation4]   ;;  %p2534_p7 = scmp.ne.s32.totalorder %s2519_s18, 0 }
  0x6f   : > { %s1972_s4 = smov [#allocation11]   ;;  %s1369_s21 = sshll.u32 %s2102_s20, 3 }
  0x70   : > { %1493 = dma.hbm_to_smem (!%p2534_p7), %s2472_s0, 32, %s1971_s2, [#allocation7]  }
  0x71   : > { %s309_s26 = sshll.u32 %s1972_s4, 4  ;;  %s1751_s7 = scalar_lea.hbm %s2475_s3, 256  ;;  %s310_s26 = int_to_ptr.vmem [resolvable:$true] %s309_s26 }
  0x72   : > { %p1752_p9 = scmp.ne.s32.totalorder %s2475_s3, %s1751_s7  ;;  %p1758_p6 = scmp.lt.u32.totalorder %s1751_s7, %s2475_s3 }
  0x74   : > { %p1754_p12 = pnand %p1752_p9, %p2533_p10 }
  0x76   : > { %p1755_p2 = pneg %p1754_p12 }
  0x78   : > { %p1760_p11 = pnand %p1758_p6, %p1755_p2 }
  0x7a   : > { %1763 = shalt.err (!%p1760_p11)
}
  0x7b   : > { %s1764_s2 = scalar_lea.vmem %s310_s26, 256  ;;  %p1772_p3 = scmp.lt.s32.totalorder %s310_s26, %s310_s26 }
  0x7c   : > { %p1765_p1 = scmp.ne.s32.totalorder %s310_s26, %s1764_s2  ;;  %p1773_p5 = scmp.lt.s32.totalorder %s1764_s2, %s1764_s2 }
  0x7e   : > { %p1767_p4 = pnand %p1765_p1, %p2533_p10  ;;  %p1774_p8 = por %p1773_p5, %p1772_p3 }
  0x80   : > { %p1768_p0 = pneg %p1767_p4 }
  0x82   : > { %p1775_p13 = pnand %p1774_p8, %p1768_p0 }
  0x84   : > { %1778 = shalt.err (!%p1775_p13)
}
  0x85   : > { %s2535_s17 = smov 128   ;;  %s1370_s9 = sshll.u32 %s1961_s28, 7 }
  0x86   : > { %1499 = dma.hbm_to_vmem [thread:$0]  (!%p2534_p7), %s2475_s3, 256, %s310_s26, [#allocation10], %s2535_s17, %s2535_s17, %s1970_s8  }
  0x87   : > { %s2243_s7 = scalar_lea.hbm %s2473_s1, %s1370_s9  ;;  %s327_s18 = scalar_lea.vmem [#allocation8], %s1369_s21 }
  0x88   : > { %s334_s12 = sshll.u32 %s327_s18, 4  ;;  %s324_s10 = scalar_lea.sflag [#allocation5], %s2102_s20  ;;  %s335_s12 = int_to_ptr.vmem [resolvable:$true] %s334_s12 }
  0x89   : > { %s1779_s6 = scalar_lea.hbm %s2243_s7, 128  ;;  %p2536_p13 = scmp.ne.s32.totalorder %s2531_s16, 0 }
  0x8a   : > { %p1780_p8 = scmp.ne.s32.totalorder %s2243_s7, %s1779_s6  ;;  %s1784_s15 = scalar_lea.hbm %s2473_s1, 256 }
  0x8b   : > { %p1785_p7 = scmp.lt.u32.totalorder %s2243_s7, %s2473_s1  ;;  %p1786_p12 = scmp.lt.u32.totalorder %s1784_s15, %s1779_s6 }
  0x8c   : > { %p1782_p10 = pnand %p1780_p8, %p2536_p13  ;;  %p1788_p6 = scmp.lt.u32.totalorder %s1779_s6, %s2243_s7 }
  0x8d   : > { %p1787_p2 = por %p1786_p12, %p1785_p7 }
  0x8e   : > { %p1783_p9 = pneg %p1782_p10 }
  0x8f   : > { %p1789_p11 = por %p1788_p6, %p1787_p2 }
  0x91   : > { %p1790_p1 = pnand %p1789_p11, %p1783_p9 }
  0x93   : > { %1793 = shalt.err (!%p1790_p1)
}
  0x94   : > { %s1794_s20 = scalar_lea.vmem %s335_s12, 128  ;;  %s1973_s21 = smov [#allocation8]  }
  0x95   : > { %p1795_p4 = scmp.ne.s32.totalorder %s335_s12, %s1794_s20  ;;  %s1799_s13 = sshll.u32 %s1973_s21, 4  ;;  %s1800_s13 = int_to_ptr.vmem [resolvable:$false] %s1799_s13 }
  0x96   : > { %s1801_s19 = scalar_lea.vmem %s1800_s13, 256  ;;  %p1802_p5 = scmp.lt.s32.totalorder %s335_s12, %s1800_s13 }
  0x97   : > { %p1797_p0 = pnand %p1795_p4, %p2536_p13  ;;  %p1803_p8 = scmp.lt.s32.totalorder %s1801_s19, %s1794_s20 }
  0x99   : > { %p1798_p3 = pneg %p1797_p0  ;;  %p1804_p10 = por %p1803_p8, %p1802_p5 }
  0x9b   : > { %p1805_p7 = pnand %p1804_p10, %p1798_p3 }
  0x9d   : > { %1808 = shalt.err (!%p1805_p7)
}
  0x9e   : > { %p2537_p12 = scmp.ne.s32.totalorder %s2527_s24, 0  ;;  %s1809_s18 = scalar_lea.hbm %s2162_s29, 4096 }
  0x9f   : > { %p1810_p9 = scmp.ne.s32.totalorder %s2162_s29, %s1809_s18  ;;  %s1814_s2 = scalar_lea.hbm %s2477_s5, 8192 }
  0xa0   : > { %1503 = dma.hbm_to_vmem [thread:$0]  (!%p2537_p12), %s2243_s7, 128, %s335_s12, %s324_s10  }
  0xa1   : > { %p1812_p2 = pnand %p1810_p9, %p2536_p13  ;;  %p1815_p11 = scmp.lt.u32.totalorder %s2162_s29, %s2477_s5 }
  0xa2   : > { %p1816_p1 = scmp.lt.u32.totalorder %s1814_s2, %s1809_s18  ;;  %p1818_p0 = scmp.lt.u32.totalorder %s1809_s18, %s2162_s29 }
  0xa3   : > { %p1813_p6 = pneg %p1812_p2 }
  0xa4   : > { %p1817_p4 = por %p1816_p1, %p1815_p11 }
  0xa6   : > { %p1819_p3 = por %p1818_p0, %p1817_p4 }
  0xa8   : > { %p1820_p5 = pnand %p1819_p3, %p1813_p6 }
  0xaa   : > { %1823 = shalt.err (!%p1820_p5)
}
  0xab   : > { %s1824_s7 = scalar_lea.vmem %s2199_s23, 4096  ;;  %s1974_s12 = smov [#allocation14]  }
  0xac   : > { %p1825_p8 = scmp.ne.s32.totalorder %s2199_s23, %s1824_s7  ;;  %s1829_s10 = sshll.u32 %s1974_s12, 4  ;;  %s1830_s10 = int_to_ptr.vmem [resolvable:$false] %s1829_s10 }
  0xad   : > { %s1831_s9 = scalar_lea.vmem %s1830_s10, 8192  ;;  %p1832_p9 = scmp.lt.s32.totalorder %s2199_s23, %s1830_s10 }
  0xae   : > { %p1827_p10 = pnand %p1825_p8, %p2536_p13  ;;  %p1833_p2 = scmp.lt.s32.totalorder %s1831_s9, %s1824_s7 }
  0xb0   : > { %p1828_p7 = pneg %p1827_p10  ;;  %p1834_p11 = por %p1833_p2, %p1832_p9 }
  0xb2   : > { %p1835_p1 = pnand %p1834_p11, %p1828_p7 }
  0xb4   : > { %1838 = shalt.err (!%p1835_p1)
}
  0xb5   : > { %1509 = dma.hbm_to_vmem [thread:$0]  (!%p2537_p12), %s2162_s29, 4096, %s2199_s23, %s2164_s22, %s2535_s17, %s2535_s17, %s1970_s8  }
  0xb6   : > { %p2538_p13 = scmp.ne.s32.totalorder %s2518_s14, 0 }
  0xb7   : > { %p2539_p6 = scmp.eq.s32.totalorder (!%p2538_p13), %s2051_s30, 0 }
  0xb8   : > { %395 = sbr.rel (%p2538_p13) target bundleno = 678 (0x2a6), region = 44 }
  0xbf   : > { %1920 = dma.done.wait (%p2539_p6), [#allocation7], 32   ;;  %p2540_p4 = pmov %p2539_p6 }
  0xc0   : > { %s2295_s16 = sand.u32 1, %s1949_s25   ;;  %p2541_p12 = scmp.ne.s32.totalorder %s2513_s11, 0 }
  0xc1   : > { %1922 = vsyncadd (%p2540_p4), [#allocation7], 4294967264  ;;  %s1379_s24 = sshll.u32 %s2295_s16, 3  ;;  %s402_s20 = scalar_lea.sflag [#allocation5], %s2295_s16 }
  0xc2   : > { %s2299_s21 = scalar_lea.vmem [#allocation8], %s1379_s24 }
  0xc3   : > { %1924 = dma.done.wait (%p2541_p12), %s402_s20, 128  }
  0xc4   : > { %1926 = vsyncadd (%p2541_p12), %s402_s20, 4294967168  ;;  %p2542_p0 = pmov %p2540_p4 }
  0xc6   : > { %1928 = dma.done.wait (%p2542_p0), [#allocation10], 512   ;;  %p2543_p3 = pmov %p2542_p0 }
  0xc7   : > { %s418_s29 = sand.u32 1, %s2051_s30   ;;  %s1382_s14 = sshll.u32 %s2295_s16, 8 }
  0xc8   : > { %1930 = vsyncadd (%p2543_p3), [#allocation10], 4294966784  ;;  %s419_s22 = scalar_lea.sflag [#allocation13], %s418_s29  ;;  %s2311_s8 = scalar_lea.vmem [#allocation12], %s1382_s14 }
  0xc9   : > { %1932 = dma.done.wait (%p2541_p12), %s419_s22, 8192  }
  0xca   : > { %1934 = vsyncadd (%p2541_p12), %s419_s22, 4294959104  ;;  %s2317_s23 = scalar_lea.vmem [#allocation14], %s1382_s14 }
  0xcb   : > { %436 = sfence }
  0xcc   : > { %s1386_s17 = sshll.u32 %s1957_s27, 7  ;;  %v1975_v0 = vmov 0.0   ;;  %v501_v1 = vld [vmem:[#allocation9 + $0x8] sm:$0xff]  ;;  %v500_v4 = vld [vmem:[#allocation9] sm:$0xff]  ;;  %v1593_v6 = vld [vmem:[%s2311_s8 + $0x14] ss:$8 sps:$4 sm:$0xff]  }
  0xcd   : > { %s497_s13 = sld [smem:[#allocation4 + %s1386_s17]]  ;;  %589 = vmatprep.mubr.f32.mxu0 %v1975_v0  ;;  %s498_s30 = sadd.s32 1, %s1386_s17  ;;  %v1587_v2 = vld [vmem:[%s2311_s8 + $0x4] ss:$8 sps:$4 sm:$0xff]   ;;  %v1589_v3 = vld [vmem:[%s2311_s8] ss:$8 sps:$4 sm:$0xff]  }
  0xce   : > { %s499_s11 = sld [smem:[#allocation4 + %s498_s30]]  ;;  %796 = vmatprep.subr.bf16.mxu1 %v1587_v2  ;;  %v1595_v7 = vld [vmem:[%s2311_s8 + $0x10] ss:$8 sps:$4 sm:$0xff]   ;;  %v1599_v10 = vld [vmem:[%s2311_s8 + $0x24] ss:$8 sps:$4 sm:$0xff]   ;;  %vm521_vm0 = vcmask 64512  }
  0xcf   : > { %797 = vmatpush1.bf16.msra.mxu1 %v1589_v3  ;;  %v1601_v13 = vld [vmem:[%s2311_s8 + $0x20] ss:$8 sps:$4 sm:$0xff]   ;;  %v1605_v16 = vld [vmem:[%s2311_s8 + $0x34] ss:$8 sps:$4 sm:$0xff]   ;;  %v1607_v20 = vld [vmem:[%s2311_s8 + $0x30] ss:$8 sps:$4 sm:$0xff]  }
  0xd0   : > { %798 = vmatprep.subr.bf16.mxu1 %v1593_v6  ;;  %v1611_v23 = vld [vmem:[%s2311_s8 + $0x44] ss:$8 sps:$4 sm:$0xff]   ;;  %v1613_v26 = vld [vmem:[%s2311_s8 + $0x40] ss:$8 sps:$4 sm:$0xff]   ;;  %v1617_v29 = vld [vmem:[%s2311_s8 + $0x54] ss:$8 sps:$4 sm:$0xff]  }
  0xd1   : > { %v520_v30 = vld [vmem:[%s2299_s21] sm:$0xff]  ;;  %v1583_v33 = vld [vmem:[%s2317_s23 + $0x4] ss:$8 sps:$4 sm:$0xff]   ;;  %v1581_v34 = vld [vmem:[%s2317_s23] ss:$8 sps:$4 sm:$0xff]   ;;  %s1385_s19 = sshll.u32 %s2295_s16, 5 }
  0xd2   : > { %v1619_v35 = vld [vmem:[%s2311_s8 + $0x50] ss:$8 sps:$4 sm:$0xff]   ;;  %v1586_v36 = vld [vmem:[%s2317_s23 + $0x14] ss:$8 sps:$4 sm:$0xff]   ;;  %v1623_v37 = vld [vmem:[%s2311_s8 + $0x64] ss:$8 sps:$4 sm:$0xff]  }
  0xd3   : > { %v502_v5 = vstv %s497_s13  ;;  %799 = vmatpush1.bf16.msra.mxu1 %v1595_v7  ;;  %v1584_v38 = vld [vmem:[%s2317_s23 + $0x10] ss:$8 sps:$4 sm:$0xff]   ;;  %v1625_v39 = vld [vmem:[%s2311_s8 + $0x60] ss:$8 sps:$4 sm:$0xff]   ;;  %v1592_v40 = vld [vmem:[%s2317_s23 + $0x24] ss:$8 sps:$4 sm:$0xff]  }
  0xd4   : > { %v504_v8 = vmul.f32 %v502_v5, %v501_v1  ;;  %v503_v9 = vmul.f32 %v502_v5, %v500_v4  ;;  %800 = vmatprep.subr.bf16.mxu1 %v1599_v10  ;;  %v511_v17 = vstv %s499_s11  ;;  %v1629_v41 = vld [vmem:[%s2311_s8 + $0x74] ss:$8 sps:$4 sm:$0xff]   ;;  %v1590_v42 = vld [vmem:[%s2317_s23 + $0x20] ss:$8 sps:$4 sm:$0xff]   ;;  %v1631_v43 = vld [vmem:[%s2311_s8 + $0x70] ss:$8 sps:$4 sm:$0xff]  }
  0xd5   : > { %v1598_v44 = vld [vmem:[%s2317_s23 + $0x34] ss:$8 sps:$4 sm:$0xff]   ;;  %v1635_v45 = vld [vmem:[%s2311_s8 + $0x84] ss:$8 sps:$4 sm:$0xff]   ;;  %v1596_v46 = vld [vmem:[%s2317_s23 + $0x30] ss:$8 sps:$4 sm:$0xff]  }
  0xd6   : > { %v506_v11 = vmax.f32 %v504_v8, 0.0  ;;  %v505_v12 = vmax.f32 %v503_v9, 0.0  ;;  %v1637_v47 = vld [vmem:[%s2311_s8 + $0x80] ss:$8 sps:$4 sm:$0xff]   ;;  %v1604_v48 = vld [vmem:[%s2317_s23 + $0x44] ss:$8 sps:$4 sm:$0xff]  }
  0xd7   : > { %801 = vmatpush1.bf16.msra.mxu1 %v1601_v13  ;;  %v1641_v49 = vld [vmem:[%s2311_s8 + $0x94] ss:$8 sps:$4 sm:$0xff]   ;;  %v1602_v50 = vld [vmem:[%s2317_s23 + $0x40] ss:$8 sps:$4 sm:$0xff]   ;;  %v1643_v52 = vld [vmem:[%s2311_s8 + $0x90] ss:$8 sps:$4 sm:$0xff]  }
  0xd8   : > { %v508_v14 = vmin.f32 %v506_v11, 1.0  ;;  %v507_v15 = vmin.f32 %v505_v12, 1.0  ;;  %802 = vmatprep.subr.bf16.mxu1 %v1605_v16  ;;  %v1610_v51 = vld [vmem:[%s2317_s23 + $0x54] ss:$8 sps:$4 sm:$0xff]   ;;  %v1647_v53 = vld [vmem:[%s2311_s8 + $0xa4] ss:$8 sps:$4 sm:$0xff]  }
  0xd9   : > { %v1608_v54 = vld [vmem:[%s2317_s23 + $0x50] ss:$8 sps:$4 sm:$0xff]   ;;  %v1649_v55 = vld [vmem:[%s2311_s8 + $0xa0] ss:$8 sps:$4 sm:$0xff]   ;;  %v1616_v56 = vld [vmem:[%s2317_s23 + $0x64] ss:$8 sps:$4 sm:$0xff]  }
  0xda   : > { %v1388_v18 = vadd.f32 -0.5, %v508_v14  ;;  %v1387_v19 = vadd.f32 -0.5, %v507_v15  ;;  %v1653_v57 = vld [vmem:[%s2311_s8 + $0xb4] ss:$8 sps:$4 sm:$0xff]   ;;  %v1614_v58 = vld [vmem:[%s2317_s23 + $0x60] ss:$8 sps:$4 sm:$0xff]  }
  0xdb   : > { %803 = vmatpush1.bf16.msra.mxu1 %v1607_v20  ;;  %v1655_v59 = vld [vmem:[%s2311_s8 + $0xb0] ss:$8 sps:$4 sm:$0xff]   ;;  %v1622_v60 = vld [vmem:[%s2317_s23 + $0x74] ss:$8 sps:$4 sm:$0xff]   ;;  %v1659_v61 = vld [vmem:[%s2311_s8 + $0xc4] ss:$8 sps:$4 sm:$0xff]  }
  0xdc   : > { %v513_v21 = vmul.f32 %v1388_v18, %v511_v17  ;;  %v512_v22 = vmul.f32 %v1387_v19, %v511_v17  ;;  %804 = vmatprep.subr.bf16.mxu1 %v1611_v23  ;;  %v1620_v62 = vld [vmem:[%s2317_s23 + $0x70] ss:$8 sps:$4 sm:$0xff]   ;;  %v1661_v63 = vld [vmem:[%s2311_s8 + $0xc0] ss:$8 sps:$4 sm:$0xff]   ;;  %v1628_v0 = vld [vmem:[%s2317_s23 + $0x84] ss:$8 sps:$4 sm:$0xff]  }
  0xdd   : > { %v1665_v1 = vld [vmem:[%s2311_s8 + $0xd4] ss:$8 sps:$4 sm:$0xff]   ;;  %v1626_v2 = vld [vmem:[%s2317_s23 + $0x80] ss:$8 sps:$4 sm:$0xff]   ;;  %v1667_v3 = vld [vmem:[%s2311_s8 + $0xd0] ss:$8 sps:$4 sm:$0xff]  }
  0xde   : > { %v515_v24 = vadd.f32 0.5, %v513_v21  ;;  %v514_v25 = vadd.f32 0.5, %v512_v22  ;;  %v1634_v4 = vld [vmem:[%s2317_s23 + $0x94] ss:$8 sps:$4 sm:$0xff]   ;;  %v1632_v5 = vld [vmem:[%s2317_s23 + $0x90] ss:$8 sps:$4 sm:$0xff]  }
  0xdf   : > { %805 = vmatpush1.bf16.msra.mxu1 %v1613_v26  ;;  %v1640_v6 = vld [vmem:[%s2317_s23 + $0xa4] ss:$8 sps:$4 sm:$0xff]   ;;  %v1638_v7 = vld [vmem:[%s2317_s23 + $0xa0] ss:$8 sps:$4 sm:$0xff]   ;;  %v1646_v8 = vld [vmem:[%s2317_s23 + $0xb4] ss:$8 sps:$4 sm:$0xff]  }
  0xe0   : > { %v517_v27 = vmax.f32 %v515_v24, 0.0  ;;  %v516_v28 = vmax.f32 %v514_v25, 0.0  ;;  %806 = vmatprep.subr.bf16.mxu1 %v1617_v29  ;;  %v1644_v9 = vld [vmem:[%s2317_s23 + $0xb0] ss:$8 sps:$4 sm:$0xff]   ;;  %v1652_v10 = vld [vmem:[%s2317_s23 + $0xc4] ss:$8 sps:$4 sm:$0xff]  }
  0xe1   : > { %v1650_v11 = vld [vmem:[%s2317_s23 + $0xc0] ss:$8 sps:$4 sm:$0xff]   ;;  %v1658_v12 = vld [vmem:[%s2317_s23 + $0xd4] ss:$8 sps:$4 sm:$0xff]   ;;  %v1656_v13 = vld [vmem:[%s2317_s23 + $0xd0] ss:$8 sps:$4 sm:$0xff]  }
  0xe2   : > { %v519_v31 = vmin.f32 %v517_v27, 1.0  ;;  %v518_v32 = vmin.f32 %v516_v28, 1.0  ;;  %v1664_v14 = vld [vmem:[%s2317_s23 + $0xe4] ss:$8 sps:$4 sm:$0xff]   ;;  %v1662_v15 = vld [vmem:[%s2317_s23 + $0xe0] ss:$8 sps:$4 sm:$0xff]  }
  0xe3   : > { %807 = vmatpush1.bf16.msra.mxu1 %v1619_v35  ;;  %v1670_v16 = vld [vmem:[%s2317_s23 + $0xf4] ss:$8 sps:$4 sm:$0xff]   ;;  %v1668_v17 = vld [vmem:[%s2317_s23 + $0xf0] ss:$8 sps:$4 sm:$0xff]   ;;  %v1671_v18 = vld [vmem:[%s2311_s8 + $0xe4] ss:$8 sps:$4 sm:$0xff]  }
  0xe4   : > { %525 = vmatprep.subr.mxu0 %v519_v31  ;;  %808 = vmatprep.subr.bf16.mxu1 %v1623_v37  ;;  %v1673_v19 = vld [vmem:[%s2311_s8 + $0xe0] ss:$8 sps:$4 sm:$0xff]   ;;  %v1676_v20 = vld [vmem:[#allocation11 + $0x4] ss:$8 sps:$4 sm:$0xff]   ;;  %v1674_v21 = vld [vmem:[#allocation11] ss:$8 sps:$4 sm:$0xff]  }
  0xe5   : > { %526 = vmatpush1.msra.mxu0 %v518_v32  ;;  %v1677_v22 = vld [vmem:[%s2311_s8 + $0xf4] ss:$8 sps:$4 sm:$0xff]   ;;  %v1679_v23 = vld [vmem:[%s2311_s8 + $0xf0] ss:$8 sps:$4 sm:$0xff]   ;;  %s2544_s18 = sld [smem:[#allocation27_spill]]  ;;  %s477_s6 = scalar_lea.vmem [#allocation16], %s1385_s19 }
  0xe6   : > { %1389 = vmatmul.mubr.msk.f32.vlgmr.msra.gmra.mrb[0].mxu0 %vm521_vm0, %v520_v30  ;;  %1049 = vmatprep.subr.bf16.mxu0 %v1583_v33  ;;  %s1152_s26 = sshll.u32 %s477_s6, 4  ;;  %s1467_s2 = sshll.u32 %s1957_s27, 9  ;;  %s2386_s26 = int_to_ptr.vmem [resolvable:$true] %s1152_s26 }
  0xe7   : > { %1050 = vmatpush1.bf16.msra.mxu0 %v1581_v34  ;;  %809 = vmatpush1.bf16.msra.mxu1 %v1625_v39  ;;  %s2545_s7 = sld [smem:[#allocation34_spill]]  ;;  %s1121_s10 = scalar_lea.sflag [#allocation17], %s2295_s16 }
  0xe8   : > { %1051 = vmatprep.subr.bf16.mxu0 %v1586_v36  ;;  %810 = vmatprep.subr.bf16.mxu1 %v1629_v41  ;;  %s1839_s9 = scalar_lea.vmem %s2386_s26, 512  ;;  %s1976_s24 = smov [#allocation16]  }
  0xe9   : > { %1081 = vmatprep.mubr.bf16.mxu0 %v1676_v20  ;;  %p1840_p5 = scmp.ne.s32.totalorder %s2386_s26, %s1839_s9  ;;  %s1843_s20 = sshll.u32 %s1976_s24, 4  ;;  %s1844_s20 = int_to_ptr.vmem [resolvable:$false] %s1843_s20 }
  0xea   : > { %s1845_s21 = scalar_lea.vmem %s1844_s20, 1024  ;;  %p1846_p9 = scmp.lt.s32.totalorder %s2386_s26, %s1844_s20 }
  0xeb   : > { %1052 = vmatpush1.bf16.msra.mxu0 %v1584_v38  ;;  %811 = vmatpush1.bf16.msra.mxu1 %v1631_v43  ;;  %p2546_p8 = scmp.ne.s32.totalorder %s2544_s18, 0  ;;  %p1847_p2 = scmp.lt.s32.totalorder %s1845_s21, %s1839_s9 }
  0xec   : > { %1053 = vmatprep.subr.bf16.mxu0 %v1592_v40  ;;  %812 = vmatprep.subr.bf16.mxu1 %v1635_v45 }
  0xed   : > { %s2392_s12 = scalar_lea.hbm %s2545_s7, %s1467_s2  ;;  %p1841_p10 = pnand %p1840_p5, %p2546_p8 }
  0xee   : > { %p1848_p11 = por %p1847_p2, %p1846_p9 }
  0xef   : > { %1054 = vmatpush1.bf16.msra.mxu0 %v1590_v42  ;;  %813 = vmatpush1.bf16.msra.mxu1 %v1637_v47  ;;  %p1842_p7 = pneg %p1841_p10 }
  0xf0   : > { %1055 = vmatprep.subr.bf16.mxu0 %v1598_v44  ;;  %814 = vmatprep.subr.bf16.mxu1 %v1641_v49 }
  0xf1   : > { %p1849_p1 = pnand %p1848_p11, %p1842_p7 }
  0xf3   : > { %1056 = vmatpush1.bf16.msra.mxu0 %v1596_v46  ;;  %815 = vmatpush1.bf16.msra.mxu1 %v1643_v52 }
  0xf4   : > { %1057 = vmatprep.subr.bf16.mxu0 %v1604_v48  ;;  %816 = vmatprep.subr.bf16.mxu1 %v1647_v53 }
  0xf7   : > { %1058 = vmatpush1.bf16.msra.mxu0 %v1602_v50  ;;  %817 = vmatpush1.bf16.msra.mxu1 %v1649_v55 }
  0xf8   : > { %1059 = vmatprep.subr.bf16.mxu0 %v1610_v51  ;;  %818 = vmatprep.subr.bf16.mxu1 %v1653_v57 }
  0xfb   : > { %1060 = vmatpush1.bf16.msra.mxu0 %v1608_v54  ;;  %819 = vmatpush1.bf16.msra.mxu1 %v1655_v59 }
  0xfc   : > { %1061 = vmatprep.subr.bf16.mxu0 %v1616_v56  ;;  %820 = vmatprep.subr.bf16.mxu1 %v1659_v61 }
  0xff   : > { %1062 = vmatpush1.bf16.msra.mxu0 %v1614_v58  ;;  %821 = vmatpush1.bf16.msra.mxu1 %v1661_v63 }
 0x100   : > { %1063 = vmatprep.subr.bf16.mxu0 %v1622_v60  ;;  %822 = vmatprep.subr.bf16.mxu1 %v1665_v1 }
 0x103   : > { %1064 = vmatpush1.bf16.msra.mxu0 %v1620_v62  ;;  %823 = vmatpush1.bf16.msra.mxu1 %v1667_v3 }
 0x104   : > { %1065 = vmatprep.subr.bf16.mxu0 %v1628_v0  ;;  %824 = vmatprep.subr.bf16.mxu1 %v1671_v18 }
 0x107   : > { %1066 = vmatpush1.bf16.msra.mxu0 %v1626_v2  ;;  %825 = vmatpush1.bf16.msra.mxu1 %v1673_v19 }
 0x108   : > { %1067 = vmatprep.subr.bf16.mxu0 %v1634_v4  ;;  %826 = vmatprep.subr.bf16.mxu1 %v1677_v22 }
 0x10b   : > { %1068 = vmatpush1.bf16.msra.mxu0 %v1632_v5  ;;  %827 = vmatpush1.bf16.msra.mxu1 %v1679_v23 }
 0x10c   : > { %1069 = vmatprep.subr.bf16.mxu0 %v1640_v6 }
 0x10f   : > { %1070 = vmatpush1.bf16.msra.mxu0 %v1638_v7 }
 0x110   : > { %1071 = vmatprep.subr.bf16.mxu0 %v1646_v8 }
 0x113   : > { %1072 = vmatpush1.bf16.msra.mxu0 %v1644_v9 }
 0x114   : > { %1073 = vmatprep.subr.bf16.mxu0 %v1652_v10 }
 0x117   : > { %1074 = vmatpush1.bf16.msra.mxu0 %v1650_v11 }
 0x118   : > { %1075 = vmatprep.subr.bf16.mxu0 %v1658_v12 }
 0x11b   : > { %1076 = vmatpush1.bf16.msra.mxu0 %v1656_v13 }
 0x11c   : > { %1077 = vmatprep.subr.bf16.mxu0 %v1664_v14 }
 0x11f   : > { %1078 = vmatpush1.bf16.msra.mxu0 %v1662_v15 }
 0x120   : > { %1079 = vmatprep.subr.bf16.mxu0 %v1670_v16 }
 0x123   : > { %1080 = vmatpush1.bf16.msra.mxu0 %v1668_v17 }
 0x126   : > { %1082 = vmatmul.mubr.bf16.vlgmr.msra.gmra.mrb[4].mxu0 %v1674_v21 }
 0x1b9   : > { %v591_v24 = vpop.f32.mrb[0].mxu0 }
 0x1ba   : > { %v596_v25 = vmax.f32 %v591_v24, 0.0  ;;  %v593_v26 = vpop.f32.mrb[1].mxu0 }
 0x1bb   : > { %v597_v27 = vmax.f32 %v593_v26, 0.0 }
 0x1bc   : > { %v598_v28 = vmin.f32 %v596_v25, 1.0 }
 0x1bd   : > { %v599_v29 = vmin.f32 %v597_v27, 1.0 }
 0x1be   : > { %v602_v31 = vpack.c.bf16 %v598_v28, %v598_v28 }
 0x1bf   : > { %v603_v30 = vpack.c.bf16 %v599_v29, %v599_v29 }
 0x1c1   : > { %828 = vmatprep.mubr.bf16.mxu1 %v603_v30 }
 0x1c2   : > { %829 = vmatmul.mubr.bf16.vlgmr.msra.gmra.mrb[0].mxu1 %v602_v31 }
 0x1f9   : > { %v1083_v32 = vpop.f32.mrb[4].mxu0 }
 0x1fa   : > { %1111 = vst [vmem:[%s477_s6] sm:$0xff] %v1083_v32  ;;  %v1085_v33 = vpop.f32.mrb[5].mxu0 }
 0x1fb   : > { %1112 = vst [vmem:[%s477_s6 + $0x8] sm:$0xff] %v1085_v33  ;;  %v1087_v34 = vpop.f32.mrb[6].mxu0 }
 0x1fc   : > { %1113 = vst [vmem:[%s477_s6 + $0x10] sm:$0xff] %v1087_v34  ;;  %v1089_v35 = vpop.f32.mrb[7].mxu0 }
 0x1fd   : > { %1114 = vst [vmem:[%s477_s6 + $0x18] sm:$0xff] %v1089_v35 }
 0x1fe   : > { %1852 = shalt.err (!%p1849_p1)
}
 0x1ff   : > { %s1853_s29 = scalar_lea.hbm %s2392_s12, 512  ;;  %s1857_s8 = scalar_lea.hbm %s2545_s7, 1024 }
 0x200   : > { %p1854_p13 = scmp.ne.s32.totalorder %s2392_s12, %s1853_s29  ;;  %p1858_p12 = scmp.lt.u32.totalorder %s2392_s12, %s2545_s7 }
 0x201   : > { %p1859_p0 = scmp.lt.u32.totalorder %s1857_s8, %s1853_s29  ;;  %p1861_p5 = scmp.lt.u32.totalorder %s1853_s29, %s2392_s12 }
 0x202   : > { %p1855_p6 = pnand %p1854_p13, %p2546_p8 }
 0x203   : > { %p1860_p3 = por %p1859_p0, %p1858_p12 }
 0x204   : > { %p1856_p4 = pneg %p1855_p6 }
 0x205   : > { %p1862_p10 = por %p1861_p5, %p1860_p3 }
 0x207   : > { %p1863_p7 = pnand %p1862_p10, %p1856_p4 }
 0x209   : > { %1866 = shalt.err (!%p1863_p7)
}
 0x20a   : > { %s1977_s13 = smov 256   ;;  %s1978_s30 = smov 16  }
 0x20b   : > { %1487 = dma.vmem_to_hbm [thread:$0]  (%p2546_p8), %s2386_s26, 512, %s2392_s12, %s1121_s10, %s1977_s13, %s1977_s13, %s1978_s30  }
 0x20c   : > { %s1384_s11 = sshll.u32 %s2295_s16, 4  ;;  %s1466_s2 = sshll.u32 %s1957_s27, 8 }
 0x20d   : > { %s470_s19 = scalar_lea.vmem [#allocation15], %s1384_s11  ;;  %s2547_s9 = sld [smem:[#allocation33_spill]] }
 0x20e   : > { %s1137_s6 = sshll.u32 %s470_s19, 4  ;;  %s1116_s26 = scalar_lea.sflag [#allocation6], %s2295_s16  ;;  %s2420_s6 = int_to_ptr.vmem [resolvable:$true] %s1137_s6 }
 0x20f   : > { %s1867_s12 = scalar_lea.vmem %s2420_s6, 256  ;;  %s1979_s27 = smov [#allocation15]  }
 0x210   : > { %p1868_p9 = scmp.ne.s32.totalorder %s2420_s6, %s1867_s12  ;;  %s1871_s10 = sshll.u32 %s1979_s27, 4  ;;  %s1872_s10 = int_to_ptr.vmem [resolvable:$false] %s1871_s10 }
 0x211   : > { %s1873_s20 = scalar_lea.vmem %s1872_s10, 512  ;;  %p1874_p1 = scmp.lt.s32.totalorder %s2420_s6, %s1872_s10 }
 0x212   : > { %p1869_p2 = pnand %p1868_p9, %p2546_p8  ;;  %p1875_p13 = scmp.lt.s32.totalorder %s1873_s20, %s1867_s12 }
 0x213   : > { %s2425_s24 = scalar_lea.hbm %s2547_s9, %s1466_s2 }
 0x214   : > { %p1870_p11 = pneg %p1869_p2  ;;  %p1876_p6 = por %p1875_p13, %p1874_p1 }
 0x216   : > { %p1877_p4 = pnand %p1876_p6, %p1870_p11 }
 0x295   : > { %v830_v36 = vpop.f32.mrb[0].mxu1 }
 0x296   : > { %1105 = vst [vmem:[%s470_s19] sm:$0xff] %v830_v36  ;;  %v832_v37 = vpop.f32.mrb[1].mxu1 }
 0x297   : > { %1106 = vst [vmem:[%s470_s19 + $0x8] sm:$0xff] %v832_v37  ;;  %v834_v38 = vpop.f32.mrb[2].mxu1 }
 0x298   : > { %v835_v39 = vpop.f32.mrb[3].mxu1 }
 0x299   : > { %1880 = shalt.err (!%p1877_p4)
}
 0x29a   : > { %s1881_s16 = scalar_lea.hbm %s2425_s24, 256  ;;  %s1885_s14 = scalar_lea.hbm %s2547_s9, 512 }
 0x29b   : > { %p1882_p12 = scmp.ne.s32.totalorder %s2425_s24, %s1881_s16  ;;  %p1886_p5 = scmp.lt.u32.totalorder %s2425_s24, %s2547_s9 }
 0x29c   : > { %p1887_p10 = scmp.lt.u32.totalorder %s1885_s14, %s1881_s16  ;;  %p1889_p9 = scmp.lt.u32.totalorder %s1881_s16, %s2425_s24 }
 0x29d   : > { %p1883_p0 = pnand %p1882_p12, %p2546_p8 }
 0x29e   : > { %p1888_p7 = por %p1887_p10, %p1886_p5 }
 0x29f   : > { %p1884_p3 = pneg %p1883_p0 }
 0x2a0   : > { %p1890_p2 = por %p1889_p9, %p1888_p7 }
 0x2a2   : > { %p1891_p11 = pnand %p1890_p2, %p1884_p3 }
 0x2a4   : > { %1894 = shalt.err (!%p1891_p11)
}
 0x2a5   : > { %1486 = dma.vmem_to_hbm [thread:$0]  (%p2546_p8), %s2420_s6, 256, %s2425_s24, %s1116_s26  }
 0x2a6 PF: > { %s2548_s23 = sld [smem:[#allocation24_spill]]  ;;  %s2549_s17 = sld [smem:[#allocation28_spill]] }
 0x2a7   : > { %s2550_s13 = sld [smem:[#allocation26_spill]] }
 0x2ac   : > { %s1167_s30 = sand.u32 1, %s2548_s23   ;;  %p2551_p1 = scmp.ne.s32.totalorder %s2549_s17, 0 }
 0x2ad   : > { %p2552_p13 = scmp.ge.s32.totalorder %s2550_s13, 2  ;;  %s1168_s11 = scalar_lea.sflag [#allocation6], %s1167_s30 }
 0x2af   : > { %p1511_p6 = pnand %p2552_p13, %p2551_p1 }
 0x2b1   : > { %1936 = dma.done.wait (!%p1511_p6), %s1168_s11, 256  }
 0x2b2   : > { %1938 = vsyncadd (!%p1511_p6), %s1168_s11, 4294967040  ;;  %s1177_s19 = scalar_lea.sflag [#allocation17], %s1167_s30 }
 0x2b3   : > { %1940 = dma.done.wait (!%p1511_p6), %s1177_s19, 512  }
 0x2b4   : > { %1942 = vsyncadd (!%p1511_p6), %s1177_s19, 4294966784  ;;  %s32_s29 = sadd.s32 1, %s2550_s13   ;;  %s2553_s18 = sld [smem:[#allocation25_spill]] }
 0x2b5   : > { %p29_p4 = scmp.ge.s32.totalorder %s32_s29, 4   ;;  %s2554_s26 = sld [smem:[#allocation30_spill]] }
 0x2b6   : > { %s2555_s6 = sld [smem:[#allocation29_spill]]  ;;  %s2556_s24 = smov %s1949_s25 }
 0x2b7   : > { %s2558_s27 = smov %s1961_s28  ;;  %31 = sbr.rel (!%p29_p4) target bundleno = 17 (0x11), region = 153 }
 0x2ba   : > { %s2557_s25 = smov %s2553_s18 }
 0x2bc   : > { %s2559_s28 = smov %s2555_s6 }
 0x2be   :  { %1182 = vsyncpa [#allocation5], 1 }
 0x2bf   :  { %1184 = vsyncpa [#allocation5 + $0x1], 1 }
 0x2c0   :  { %1185 = vsyncpa [#allocation10], 1 }
 0x2c1   :  { %1186 = vsyncpa [#allocation13], 1 }
 0x2c2   :  { %1188 = vsyncpa [#allocation13 + $0x1], 1 }
 0x2c3   :  { %1189 = vsyncpa [#allocation6], 1 }
 0x2c4   :  { %1191 = vsyncpa [#allocation6 + $0x1], 1 }
 0x2c5   :  { %1192 = vsyncpa [#allocation17], 1 }
 0x2c6   :  { %1194 = vsyncpa [#allocation17 + $0x1], 1 }
 0x2c7   :  { %1195 = vsyncpa [#allocation7], 1 }
 0x2c8   :  { %1197 = vsyncpa [#allocation7 + $0x1], 1 }

</bundles_post_ra>
